<compile_context>
chip_gen: v5e
topology: v5e:2x2
jax: 0.10.0
libtpu: 0.0.40
codegen_flags: <defaults>
</compile_context>

<pallas_src>
import jax
import jax.numpy as jnp
from jax import lax
from jax.experimental import pallas as pl
from jax.experimental.pallas import tpu as pltpu


def _make_f1_partials_kernel(n_rows, tile_n, tiles_per_core):
    def kernel(y_pred_ref, y_true_ref, out_ref):
        core = pl.program_id(0)   # parallel axis (per-core partials)
        step = pl.program_id(1)   # arbitrary axis (batch-tile reduction)

        @pl.when(step == 0)
        def _init():
            out_ref[...] = jnp.zeros_like(out_ref)

        logits = y_pred_ref[...].astype(jnp.float32)   # (tile_n, C)
        labels = y_true_ref[...]                       # (tile_n, 1) int32
        tn, c = logits.shape

        # Row-validity mask: kills padded remainder rows and tiles whose
        # (clamped) DMA index lies past the end of the batch.
        tile_idx = core * tiles_per_core + step
        base = tile_idx * tile_n
        row_ids = base + lax.broadcasted_iota(jnp.int32, (tn, 1), 0)
        row_valid = row_ids < n_rows                   # (tile_n, 1) bool

        # Softmax over the class (lane) axis; normalization on the EUP.
        m = jnp.max(logits, axis=1, keepdims=True)
        e = jnp.exp(logits - m)
        p = e * pl.reciprocal(jnp.sum(e, axis=1, keepdims=True), approx=True)

        # one-hot "hit" mask built from a lane iota (no float one-hot tensor).
        cls_ids = lax.broadcasted_iota(jnp.int32, (tn, c), 1)
        hit = jnp.logical_and(cls_ids == labels, row_valid)   # (tile_n, C)

        zero = jnp.zeros_like(p)
        tp = jnp.sum(jnp.where(hit, p, zero), axis=0, keepdims=True)        # (1, C)
        sum_p = jnp.sum(jnp.where(row_valid, p, zero), axis=0, keepdims=True)
        cnt = jnp.sum(hit.astype(jnp.float32), axis=0, keepdims=True)

        out_ref[...] += jnp.concatenate([tp, sum_p, cnt], axis=0)[None, :, :]

    return kernel


def f1_loss(y_pred, y_true, classes=18, epsilon=1e-7, tile_n=1024, num_cores=2):
    """Soft multi-class F1 loss; forward-equivalent to the PyTorch F1Loss."""
    assert y_pred.ndim == 2
    assert y_true.ndim == 1
    n, c = y_pred.shape
    assert c == classes

    # Batch tile: divisible by 8 (sublane constraint) or equal to the full
    # batch dim. ~1024 rows double-buffers in well under the 32 MiB scoped /
    # 64 MiB physical VMEM budget on every generation (incl. v7x).
    if tile_n >= n:
        tile_n = n
    else:
        tile_n = max(8, (tile_n // 8) * 8)

    total_tiles = pl.cdiv(n, tile_n)
    num_cores = max(1, min(num_cores, total_tiles))
    tiles_per_core = pl.cdiv(total_tiles, num_cores)

    y_true_2d = y_true.astype(jnp.int32).reshape(n, 1)

    def inp_map(ci, ti):
        # Clamp so over-hanging (core, tile) pairs DMA a valid block; their
        # contribution is zeroed by the in-kernel row mask.
        idx = jnp.minimum(ci * tiles_per_core + ti, total_tiles - 1)
        return (idx, 0)

    partials = pl.pallas_call(
        _make_f1_partials_kernel(n, tile_n, tiles_per_core),
        out_shape=jax.ShapeDtypeStruct((num_cores, 3, c), jnp.float32),
        grid_spec=pltpu.PrefetchScalarGridSpec(
            num_scalar_prefetch=0,
            grid=(num_cores, tiles_per_core),
            in_specs=[
                pl.BlockSpec((tile_n, c), inp_map),   # y_pred tile
                pl.BlockSpec((tile_n, 1), inp_map),   # y_true tile
            ],
            out_specs=pl.BlockSpec((1, 3, c), lambda ci, ti: (ci, 0, 0)),
        ),
        compiler_params=pltpu.CompilerParams(
            dimension_semantics=("parallel", "arbitrary")),
        cost_estimate=pl.CostEstimate(
            flops=12 * n * c,
            transcendentals=n * c,
            bytes_accessed=n * c * y_pred.dtype.itemsize + n * 4
                           + num_cores * 3 * c * 4),
    )(y_pred, y_true_2d)

    # Tiny (C,)-sized epilogue in plain JAX.
    parts = jnp.sum(partials, axis=0)              # combine per-core partials
    tp, sum_p, cnt = parts[0], parts[1], parts[2]
    precision = tp / (sum_p + epsilon)             # tp + fp == sum_p
    recall = tp / (cnt + epsilon)                  # tp + fn == count(y_true)
    f1 = 2.0 * (precision * recall) / (precision + recall + epsilon)
    f1 = jnp.clip(f1, epsilon, 1.0 - epsilon)
    return 1.0 - jnp.mean(f1)


def _f1_loss_ref(y_pred, y_true, classes=18, epsilon=1e-7):
    """Pure-JAX reference mirroring the PyTorch module."""
    y_true_oh = jax.nn.one_hot(y_true, classes, dtype=jnp.float32)
    p = jax.nn.softmax(y_pred.astype(jnp.float32), axis=1)
    tp = jnp.sum(y_true_oh * p, axis=0)
    fp = jnp.sum((1.0 - y_true_oh) * p, axis=0)
    fn = jnp.sum(y_true_oh * (1.0 - p), axis=0)
    precision = tp / (tp + fp + epsilon)
    recall = tp / (tp + fn + epsilon)
    f1 = 2.0 * (precision * recall) / (precision + recall + epsilon)
    f1 = jnp.clip(f1, epsilon, 1.0 - epsilon)
    return 1.0 - jnp.mean(f1)


if __name__ == "__main__":
    CLASSES = 18
    N = 37  # deliberately not a multiple of 8 to exercise the remainder mask

    key = jax.random.PRNGKey(0)
    k_pred, k_true = jax.random.split(key)
    y_pred = jax.random.normal(k_pred, (N, CLASSES), dtype=jnp.float32)
    y_true = jax.random.randint(k_true, (N,), 0, CLASSES, dtype=jnp.int32)

    ref = _f1_loss_ref(y_pred, y_true, classes=CLASSES, epsilon=1e-7)

    # Path 1: single full-batch tile (tile_n >= N).
    loss_single = jax.block_until_ready(
        f1_loss(y_pred, y_true, classes=CLASSES, epsilon=1e-7))
    # Path 2: multi-tile grid with remainder masking + 2-way core split.
    loss_tiled = jax.block_until_ready(
        f1_loss(y_pred, y_true, classes=CLASSES, epsilon=1e-7,
                tile_n=16, num_cores=2))
    # Path 3: bf16 input fed directly (no wrapper-side f32 copy in HBM).
    y_pred_bf16 = y_pred.astype(jnp.bfloat16)
    ref_bf16 = _f1_loss_ref(y_pred_bf16, y_true, classes=CLASSES, epsilon=1e-7)
    loss_bf16 = jax.block_until_ready(
        f1_loss(y_pred_bf16, y_true, classes=CLASSES, epsilon=1e-7))

    # Tolerance covers pl.reciprocal(approx=True) (~2^-14 relative on softmax).
    assert jnp.allclose(loss_single, ref, atol=5e-4), (loss_single, ref)
    assert jnp.allclose(loss_tiled, ref, atol=5e-4), (loss_tiled, ref)
    assert jnp.allclose(loss_bf16, ref_bf16, atol=5e-4), (loss_bf16, ref_bf16)

    print("KERNEL_OK")
</pallas_src>

<mosaic_0001>
module attributes {stable_mosaic.version = 11 : i64} {
  func.func @kernel(%arg0: i32, %arg1: i32, %arg2: memref<37x18xf32, #tpu.memory_space<vmem>>, %arg3: memref<37x1xi32, #tpu.memory_space<vmem>>, %arg4: memref<1x3x18xf32, #tpu.memory_space<vmem>>) attributes {dimension_semantics = [#tpu.dimension_semantics<parallel>, #tpu.dimension_semantics<arbitrary>], iteration_bounds = array<i64: 1, 1>, scalar_prefetch = 0 : i64, scratch_operands = 0 : i64, tpu.core_type = #tpu.core_type<tc>, window_params = [{transform_indices = @transform_0, window_bounds = array<i64: 37, 18>}, {transform_indices = @transform_1, window_bounds = array<i64: 37, 1>}, {transform_indices = @transform_2, window_bounds = array<i64: 1, 3, 18>}]} {
    %c0_i32 = arith.constant 0 : i32
    %0 = arith.cmpi eq, %arg1, %c0_i32 : i32
    %1 = arith.extui %0 : i1 to i32
    %c0_i32_0 = arith.constant 0 : i32
    %2 = arith.cmpi ne, %1, %c0_i32_0 : i32
    scf.if %2 {
      %cst_16 = arith.constant 0.000000e+00 : f32
      %46 = vector.broadcast %cst_16 : f32 to vector<1x3x18xf32>
      %c0_17 = arith.constant 0 : index
      %c0_18 = arith.constant 0 : index
      %c0_19 = arith.constant 0 : index
      %47 = vector.load %arg4[%c0_17, %c0_18, %c0_19] : memref<1x3x18xf32, #tpu.memory_space<vmem>>, vector<1x3x18xf32>
      tpu.vector_store %arg4[%c0_17, %c0_18, %c0_19], %46 {strides = array<i32>} : memref<1x3x18xf32, #tpu.memory_space<vmem>>, vector<1x3x18xf32>,
    } else {
    }
    %c0 = arith.constant 0 : index
    %c0_1 = arith.constant 0 : index
    %3 = vector.load %arg2[%c0, %c0_1] : memref<37x18xf32, #tpu.memory_space<vmem>>, vector<37x18xf32>
    %c0_2 = arith.constant 0 : index
    %c0_3 = arith.constant 0 : index
    %4 = vector.load %arg3[%c0_2, %c0_3] : memref<37x1xi32, #tpu.memory_space<vmem>>, vector<37x1xi32>
    %c1_i32 = arith.constant 1 : i32
    %5 = arith.muli %arg0, %c1_i32 : i32
    %6 = arith.addi %5, %arg1 : i32
    %c37_i32 = arith.constant 37 : i32
    %7 = arith.muli %6, %c37_i32 : i32
    %8 = tpu.iota {dimensions = array<i32: 0>} : vector<37x1xi32>
    %9 = vector.broadcast %7 : i32 to vector<37x1xi32>
    %10 = arith.addi %9, %8 : vector<37x1xi32>
    %c37_i32_4 = arith.constant 37 : i32
    %11 = vector.broadcast %c37_i32_4 : i32 to vector<37x1xi32>
    %12 = arith.cmpi slt, %10, %11 : vector<37x1xi32>
    %cst = arith.constant dense<0xFF800000> : vector<37xf32>
    %13 = vector.multi_reduction <maximumf>, %3, %cst [1] : vector<37x18xf32> to vector<37xf32>
    %14 = vector.shape_cast %13 : vector<37xf32> to vector<37x1xf32>
    %15 = vector.broadcast %14 : vector<37x1xf32> to vector<37x18xf32>
    %16 = arith.subf %3, %15 : vector<37x18xf32>
    %17 = math.exp %16 : vector<37x18xf32>
    %cst_5 = arith.constant dense<0.000000e+00> : vector<37xf32>
    %18 = vector.multi_reduction <add>, %17, %cst_5 [1] : vector<37x18xf32> to vector<37xf32>
    %19 = vector.shape_cast %18 : vector<37xf32> to vector<37x1xf32>
    %20 = tpu.reciprocal %19 {approx = true} : vector<37x1xf32> -> vector<37x1xf32>
    %21 = vector.broadcast %20 : vector<37x1xf32> to vector<37x18xf32>
    %22 = arith.mulf %17, %21 : vector<37x18xf32>
    %23 = tpu.iota {dimensions = array<i32: 1>} : vector<37x18xi32>
    %24 = vector.broadcast %4 : vector<37x1xi32> to vector<37x18xi32>
    %25 = arith.cmpi eq, %23, %24 : vector<37x18xi32>
    %26 = vector.broadcast %12 : vector<37x1xi1> to vector<37x18xi1>
    %27 = arith.andi %25, %26 : vector<37x18xi1>
    %cst_6 = arith.constant 0.000000e+00 : f32
    %28 = vector.broadcast %cst_6 : f32 to vector<37x18xf32>
    %29 = arith.select %27, %22, %28 : vector<37x18xi1>, vector<37x18xf32>
    %cst_7 = arith.constant dense<0.000000e+00> : vector<18xf32>
    %30 = vector.multi_reduction <add>, %29, %cst_7 [0] : vector<37x18xf32> to vector<18xf32>
    %31 = vector.shape_cast %30 : vector<18xf32> to vector<1x18xf32>
    %32 = vector.shape_cast %12 : vector<37x1xi1> to vector<37x1xi1>
    %33 = vector.broadcast %32 : vector<37x1xi1> to vector<37x18xi1>
    %34 = arith.select %33, %22, %28 : vector<37x18xi1>, vector<37x18xf32>
    %cst_8 = arith.constant dense<0.000000e+00> : vector<18xf32>
    %35 = vector.multi_reduction <add>, %34, %cst_8 [0] : vector<37x18xf32> to vector<18xf32>
    %36 = vector.shape_cast %35 : vector<18xf32> to vector<1x18xf32>
    %37 = arith.extui %27 : vector<37x18xi1> to vector<37x18xi32>
    %38 = arith.sitofp %37 : vector<37x18xi32> to vector<37x18xf32>
    %cst_9 = arith.constant dense<0.000000e+00> : vector<18xf32>
    %39 = vector.multi_reduction <add>, %38, %cst_9 [0] : vector<37x18xf32> to vector<18xf32>
    %40 = vector.shape_cast %39 : vector<18xf32> to vector<1x18xf32>
    %c0_10 = arith.constant 0 : index
    %c0_11 = arith.constant 0 : index
    %c0_12 = arith.constant 0 : index
    %41 = vector.load %arg4[%c0_10, %c0_11, %c0_12] : memref<1x3x18xf32, #tpu.memory_space<vmem>>, vector<1x3x18xf32>
    %42 = tpu.concatenate %31, %36, %40 in 0 : vector<1x18xf32>, vector<1x18xf32>, vector<1x18xf32> -> vector<3x18xf32>
    %43 = vector.shape_cast %42 : vector<3x18xf32> to vector<1x3x18xf32>
    %44 = arith.addf %41, %43 : vector<1x3x18xf32>
    %c0_13 = arith.constant 0 : index
    %c0_14 = arith.constant 0 : index
    %c0_15 = arith.constant 0 : index
    %45 = vector.load %arg4[%c0_13, %c0_14, %c0_15] : memref<1x3x18xf32, #tpu.memory_space<vmem>>, vector<1x3x18xf32>
    tpu.vector_store %arg4[%c0_13, %c0_14, %c0_15], %44 {strides = array<i32>} : memref<1x3x18xf32, #tpu.memory_space<vmem>>, vector<1x3x18xf32>,
    return
  }
  func.func @transform_0(%arg0: i32, %arg1: i32) -> (i32, i32) {
    %c1_i32 = arith.constant 1 : i32
    %0 = arith.muli %arg0, %c1_i32 : i32
    %1 = arith.addi %0, %arg1 : i32
    %c0_i32 = arith.constant 0 : i32
    %2 = arith.minsi %1, %c0_i32 : i32
    %c0_i32_0 = arith.constant 0 : i32
    %c0_i32_1 = arith.constant 0 : i32
    return %2, %c0_i32_0 : i32, i32
  }
  func.func @transform_1(%arg0: i32, %arg1: i32) -> (i32, i32) {
    %c1_i32 = arith.constant 1 : i32
    %0 = arith.muli %arg0, %c1_i32 : i32
    %1 = arith.addi %0, %arg1 : i32
    %c0_i32 = arith.constant 0 : i32
    %2 = arith.minsi %1, %c0_i32 : i32
    %c0_i32_0 = arith.constant 0 : i32
    %c0_i32_1 = arith.constant 0 : i32
    return %2, %c0_i32_0 : i32, i32
  }
  func.func @transform_2(%arg0: i32, %arg1: i32) -> (i32, i32, i32) {
    %c0_i32 = arith.constant 0 : i32
    %c0_i32_0 = arith.constant 0 : i32
    %c0_i32_1 = arith.constant 0 : i32
    return %arg0, %c0_i32, %c0_i32_0 : i32, i32, i32
  }
}

</mosaic_0001>

<bundles_post_ra>
// kernel: tpu_custom_call.1
= control target key start
LH: loop header
LB: loop body
LE: loop exit
PB: predicated region body
PF: predicated region fallthrough
CT: control target
= control target key end

     0   :  { %vm110_vm0 = vcmask 146432   ;;  %vm123_vm1 = vcmask 143360   ;;  %v323_v2 = vmov 0   ;;  %vm79_vm2 = vcmask 141312   ;;  %s422_s0 = inlined_call_operand.vmem [shape: f32[37,18], index: 0, kind: input, shape index: {}]   ;;  %s423_s1 = inlined_call_operand.vmem [shape: s32[37,1], index: 1, kind: input, shape index: {}]   ;;  %s424_s2 = inlined_call_operand.vmem [shape: f32[1,3,18], index: 2, kind: output, shape index: {}]  }
   0x1   :  { %v83_v0 = vld [vmem:[%s422_s0 + $0x10] sm:$0xff]  ;;  %v81_v1 = vld [vmem:[%s422_s0] sm:$0xff]  ;;  %300 = vset.pattern.permute.xlu1 %v323_v2  ;;  %301 = vset.pattern.permute.xlu2 %v323_v2  ;;  %v84_v7 = vld [vmem:[%s422_s0 + $0x18] sm:$0xff]  ;;  %v324_v33 = vmov 0.0   ;;  %v93_v49 = vlaneseq  ;;  %vm270_vm10 = vcmask 1040384   ;;  %vm272_vm11 = vcmask 1041408  }
   0x2   :  { %v117_v3 = vsel %vm110_vm0, %v83_v0, -inf  ;;  %v111_v4 = vsel %vm110_vm0, %v81_v1, -inf  ;;  %v85_v5 = vld [vmem:[%s422_s0 + $0x20] sm:$0x1f]  ;;  %302 = vset.pattern.permute.xlu0 %v323_v2  ;;  %v82_v8 = vld [vmem:[%s422_s0 + $0x8] sm:$0xff]  ;;  %v120_v9 = vsel %vm110_vm0, %v84_v7, -inf }
   0x3   :  { %118 = vmax.xlane.f32.xlu1 %v117_v3  ;;  %112 = vmax.xlane.f32.xlu0 %v111_v4  ;;  %v124_v6 = vsel %vm123_vm1, %v85_v5, -inf  ;;  %v114_v10 = vsel %vm110_vm0, %v82_v8, -inf  ;;  %v87_v11 = vld [vmem:[%s423_s1 + $0x8] sm:$0xff]  ;;  %v86_v12 = vld [vmem:[%s423_s1] sm:$0xff]  ;;  %80 = vst.msk [vmem:[%s424_s2] sm:$0x7] %vm79_vm2, %v324_v33 }
   0x4   :  { %125 = vmax.xlane.f32.xlu2 %v124_v6  ;;  %v90_v39 = vld [vmem:[%s423_s1 + $0x20] sm:$0x1f]  ;;  %v89_v40 = vld [vmem:[%s423_s1 + $0x18] sm:$0xff]  ;;  %v88_v41 = vld [vmem:[%s423_s1 + $0x10] sm:$0xff]  ;;  %v94_v50 = vshrl.u32 %v93_v49, 7  ;;  %v168_v63 = vand.u32 127, %v93_v49 }
   0x6   :  { %v98_v56 = vadd.s32 32, %v94_v50 }
   0x8   :  { %vm109_vm3 = vcmp.lt.s32.totalorder %v98_v56, 37 }
   0xb   :  { %121 = vmax.xlane.f32.xlu1 %v120_v9  ;;  %115 = vmax.xlane.f32.xlu0 %v114_v10 }
  0x1c   :  { %173 = vperm.xlu2 %301, %v87_v11  }
  0x24   :  { %170 = vperm.xlu1 %300, %v86_v12  }
  0x76   :  { %v119_v13 = vpop.xlane.xlu1 %118  ;;  %v113_v14 = vpop.xlane.xlu0 %112 }
  0x77   :  { %v129_v15 = vsub.f32 %v83_v0, %v119_v13  ;;  %v127_v16 = vsub.f32 %v81_v1, %v113_v14  ;;  %v126_v19 = vpop.xlane.xlu2 %125 }
  0x78   :  { %v131_v24 = vsub.f32 %v85_v5, %v126_v19 }
  0x79   :  { %v136_v17 = vmul.f32 1.442695, %v129_v15  ;;  %v132_v18 = vmul.f32 1.442695, %v127_v16 }
  0x7a   :  { %v140_v31 = vmul.f32 1.442695, %v131_v24 }
  0x7b   :  { %303 = vpow2.f32 %v136_v17 }
  0x7c   :  { %305 = vpow2.f32 %v132_v18 }
  0x7e   :  { %v122_v20 = vpop.xlane.xlu1 %121  ;;  %v116_v21 = vpop.xlane.xlu0 %115 }
  0x7f   :  { %v130_v22 = vsub.f32 %v84_v7, %v122_v20  ;;  %v128_v23 = vsub.f32 %v82_v8, %v116_v21  ;;  %v174_v42 = vpop.permute.xlu2 %173 }
  0x80   :  { %vm185_vm4 = vcmp.eq.s32.totalorder %v168_v63, %v174_v42 }
  0x81   :  { %v304_v25 = vpop.eup %303  ;;  %v138_v26 = vmul.f32 1.442695, %v130_v22  ;;  %v134_v27 = vmul.f32 1.442695, %v128_v23  ;;  %v294_v9 = vsel %vm185_vm4, 1.0, %v324_v33 }
  0x82   :  { %v306_v28 = vpop.eup %305  ;;  %v148_v29 = vsel %vm110_vm0, %v304_v25, 0.0  ;;  %v255_v14 = vsel %vm110_vm0, %v294_v9, 0.0 }
  0x83   :  { %307 = vpow2.f32 %v138_v26  ;;  %149 = vadd.xlane.f32.xlu1 %v148_v29  ;;  %v142_v30 = vsel %vm110_vm0, %v306_v28, 0.0 }
  0x84   :  { %309 = vpow2.f32 %v134_v27  ;;  %143 = vadd.xlane.f32.xlu2 %v142_v30 }
  0x85   :  { %311 = vpow2.f32 %v140_v31 }
  0x89   :  { %v308_v32 = vpop.eup %307 }
  0x8a   :  { %v310_v34 = vpop.eup %309  ;;  %v151_v35 = vsel %vm110_vm0, %v308_v32, 0.0 }
  0x8b   :  { %v145_v36 = vsel %vm110_vm0, %v310_v34, 0.0  ;;  %v312_v37 = vpop.eup %311 }
  0x8c   :  { %152 = vadd.xlane.f32.xlu2 %v151_v35  ;;  %146 = vadd.xlane.f32.xlu0 %v145_v36  ;;  %v154_v38 = vsel %vm123_vm1, %v312_v37, 0.0 }
  0x94   :  { %155 = vadd.xlane.f32.xlu0 %v154_v38 }
  0x96   :  { %v171_v43 = vpop.permute.xlu1 %170 }
  0x97   :  { %vm184_vm5 = vcmp.eq.s32.totalorder %v168_v63, %v171_v43 }
  0x98   :  { %v293_v10 = vsel %vm184_vm5, 1.0, %v324_v33 }
  0x99   :  { %v254_v15 = vsel %vm110_vm0, %v293_v10, 0.0 }
  0x9a   :  { %v256_v21 = vadd.f32 %v255_v14, %v254_v15 }
  0x9c   :  { %182 = vperm.xlu1 %300, %v90_v39  }
  0xa4   :  { %179 = vperm.xlu2 %301, %v89_v40  }
  0xa8   :  { %176 = vperm.xlu0 %302, %v88_v41  }
  0xf6   :  { %v150_v45 = vpop.xlane.xlu1 %149 }
  0xf7   :  { %v144_v44 = vpop.xlane.xlu2 %143 }
  0xf8   :  { %313 = vrcp.f32 %v144_v44 }
  0xfe   :  { %v314_v48 = vpop.eup %313 }
  0xff   :  { %v147_v46 = vpop.xlane.xlu0 %146  ;;  %v153_v47 = vpop.xlane.xlu2 %152  ;;  %v162_v52 = vmul.f32 %v314_v48, %v306_v28 }
 0x100   :  { %315 = vrcp.f32 %v147_v46 }
 0x101   :  { %317 = vrcp.f32 %v150_v45  ;;  %v229_v59 = vsel %vm110_vm0, %v162_v52, 0.0  ;;  %v204_v16 = vsel %vm184_vm5, %v162_v52, 0.0 }
 0x102   :  { %319 = vrcp.f32 %v153_v47  ;;  %v209_v23 = vsel %vm110_vm0, %v204_v16, 0.0 }
 0x106   :  { %v316_v51 = vpop.eup %315 }
 0x107   :  { %v156_v53 = vpop.xlane.xlu0 %155  ;;  %v318_v54 = vpop.eup %317  ;;  %v163_v55 = vmul.f32 %v316_v51, %v310_v34 }
 0x108   :  { %321 = vrcp.f32 %v156_v53  ;;  %v164_v58 = vmul.f32 %v318_v54, %v304_v25  ;;  %v320_v60 = vpop.eup %319  ;;  %v180_v11 = vpop.permute.xlu2 %179 }
 0x109   :  { %v230_v57 = vsel %vm110_vm0, %v163_v55, 0.0  ;;  %v165_v0 = vmul.f32 %v320_v60, %v308_v32  ;;  %v205_v12 = vsel %vm185_vm4, %v163_v55, 0.0  ;;  %vm187_vm7 = vcmp.eq.s32.totalorder %v168_v63, %v180_v11 }
 0x10a   :  { %v231_v61 = vadd.f32 %v230_v57, %v229_v59  ;;  %v232_v2 = vsel %vm110_vm0, %v164_v58, 0.0  ;;  %v210_v17 = vsel %vm110_vm0, %v205_v12, 0.0  ;;  %v296_v24 = vsel %vm187_vm7, 1.0, %v324_v33  ;;  %v269_v59 = vld [vmem:[%s424_s2] sm:$0x7] }
 0x10b   :  { %v234_v5 = vsel %vm110_vm0, %v165_v0, 0.0  ;;  %v207_v22 = vsel %vm187_vm7, %v165_v0, 0.0  ;;  %v211_v25 = vadd.f32 %v210_v17, %v209_v23 }
 0x10c   :  { %v233_v3 = vadd.f32 %v232_v2, %v231_v61  ;;  %v214_v36 = vsel %vm110_vm0, %v207_v22, 0.0 }
 0x10e   :  { %v322_v62 = vpop.eup %321  ;;  %v183_v7 = vpop.permute.xlu1 %182  ;;  %v235_v8 = vadd.f32 %v234_v5, %v233_v3 }
 0x10f   :  { %v166_v1 = vmul.f32 %v322_v62, %v312_v37  ;;  %vm188_vm6 = vcmp.eq.s32.totalorder %v168_v63, %v183_v7  ;;  %v259_v37 = vsel %vm110_vm0, %v296_v24, 0.0 }
 0x110   :  { %vm397_vm8 = vmand %vm188_vm6, %vm109_vm3 }
 0x111   :  { %v228_v4 = vsel %vm109_vm3, %v166_v1, 0.0  ;;  %v208_v28 = vsel %vm397_vm8, %v166_v1, 0.0  ;;  %v297_v31 = vsel %vm397_vm8, 1.0, %v324_v33 }
 0x112   :  { %v236_v6 = vsel %vm123_vm1, %v228_v4, 0.0  ;;  %v216_v40 = vsel %vm123_vm1, %v208_v28, 0.0  ;;  %v261_v41 = vsel %vm123_vm1, %v297_v31, 0.0 }
 0x113   :  { %v237_v13 = vadd.f32 %v236_v6, %v235_v8 }
 0x115   :  { %v238_v19 = vrot.slane %v237_v13, 4 }
 0x117   :  { %v239_v32 = vadd.f32 %v238_v19, %v237_v13 }
 0x119   :  { %v240_v42 = vrot.slane %v239_v32, 2 }
 0x11a   :  { %v177_v20 = vpop.permute.xlu0 %176 }
 0x11b   :  { %vm186_vm9 = vcmp.eq.s32.totalorder %v168_v63, %v177_v20  ;;  %v241_v47 = vadd.f32 %v240_v42, %v239_v32 }
 0x11c   :  { %v206_v26 = vsel %vm186_vm9, %v164_v58, 0.0  ;;  %v295_v27 = vsel %vm186_vm9, 1.0, %v324_v33 }
 0x11d   :  { %v212_v29 = vsel %vm110_vm0, %v206_v26, 0.0  ;;  %v257_v30 = vsel %vm110_vm0, %v295_v27, 0.0  ;;  %v242_v51 = vrot.slane %v241_v47, 1 }
 0x11e   :  { %v213_v34 = vadd.f32 %v212_v29, %v211_v25  ;;  %v258_v35 = vadd.f32 %v257_v30, %v256_v21 }
 0x11f   :  { %v243_v56 = vadd.f32 %v242_v51, %v241_v47 }
 0x120   :  { %v215_v38 = vadd.f32 %v214_v36, %v213_v34  ;;  %v260_v39 = vadd.f32 %v259_v37, %v258_v35 }
 0x122   :  { %v217_v43 = vadd.f32 %v216_v40, %v215_v38  ;;  %v262_v44 = vadd.f32 %v261_v41, %v260_v39 }
 0x124   :  { %v218_v45 = vrot.slane %v217_v43, 4  ;;  %v263_v46 = vrot.slane %v262_v44, 4 }
 0x126   :  { %v219_v33 = vadd.f32 %v218_v45, %v217_v43  ;;  %v264_v48 = vadd.f32 %v263_v46, %v262_v44 }
 0x128   :  { %v220_v49 = vrot.slane %v219_v33, 2  ;;  %v265_v50 = vrot.slane %v264_v48, 2 }
 0x12a   :  { %v221_v52 = vadd.f32 %v220_v49, %v219_v33  ;;  %v266_v53 = vadd.f32 %v265_v50, %v264_v48 }
 0x12c   :  { %v222_v54 = vrot.slane %v221_v52, 1  ;;  %v267_v55 = vrot.slane %v266_v53, 1 }
 0x12e   :  { %v223_v57 = vadd.f32 %v222_v54, %v221_v52  ;;  %v268_v58 = vadd.f32 %v267_v55, %v266_v53 }
 0x130   :  { %v271_v60 = vsel %vm270_vm10, %v223_v57, %v243_v56 }
 0x131   :  { %v273_v61 = vsel %vm272_vm11, %v271_v60, %v268_v58 }
 0x132   :  { %v274_v62 = vadd.f32 %v273_v61, %v269_v59 }
 0x134   :  { %276 = vst.msk [vmem:[%s424_s2] sm:$0x7] %vm79_vm2, %v274_v62 }

</bundles_post_ra>
